<compile_context>
chip_gen: v5e
topology: v5e:2x2
jax: 0.10.0
libtpu: 0.0.40
codegen_flags: <defaults>
</compile_context>

<pallas_src>
import math

import jax
import jax.numpy as jnp
from jax.experimental import pallas as pl
from jax.experimental.pallas import tpu as pltpu


# ----------------------------------------------------------------------------
# Streaming per-row stats kernel
#   outputs (all (B,1) f32):
#     m_out : max_j!=t  s*x[b,j]       (online max, target excluded)
#     l_out : sum_j!=t exp(s*x[b,j]-m) (online sum-exp, target excluded)
#     c_out : x[b, target[b]]          (raw gathered target logit)
# ----------------------------------------------------------------------------
def _make_stats_kernel(s, classes, ragged):
    s = float(s)
    neg_inf = float("-inf")

    def kernel(tmin_ref, tmax_ref, x_ref, tgt_ref, m_out, l_out, c_out):
        i = pl.program_id(0)                  # batch tile ("parallel")
        j = pl.program_id(1)                  # class tile ("arbitrary", innermost)
        TB, TC = x_ref.shape
        lo = j * TC

        @pl.when(j == 0)
        def _init():
            m_out[...] = jnp.full_like(m_out, neg_inf)
            l_out[...] = jnp.zeros_like(l_out)
            c_out[...] = jnp.zeros_like(c_out)

        x_nat = x_ref[...]                    # native dtype (bf16 or f32)
        # TODO(synk): bf16 exp/compare path on v6e/v7x (~2x VPU/EUP throughput
        # for bf16 inputs); kept f32 so v5e (no bf16 EUP) works unconditionally.
        z = x_nat.astype(jnp.float32) * s     # scaled logits, f32

        if ragged:
            # Mask padded lanes of the (partial) last class tile.
            col_ok = jax.lax.broadcasted_iota(jnp.int32, (TB, TC), 1) < (classes - lo)
            z = jnp.where(col_ok, z, neg_inf)

        # Scalar-prefetched per-batch-tile target range: skip gather work on
        # class tiles that cannot contain any of this tile's targets.
        has_target = jnp.logical_and(tmax_ref[i] >= lo, tmin_ref[i] < lo + TC)

        def _update(z_masked):
            m_prev = m_out[...]
            m_new = jnp.maximum(m_prev, jnp.max(z_masked, axis=-1, keepdims=True))
            l_out[...] = (l_out[...] * jnp.exp(m_prev - m_new)
                          + jnp.sum(jnp.exp(z_masked - m_new), axis=-1,
                                    keepdims=True))
            m_out[...] = m_new

        @pl.when(has_target)
        def _with_target():
            # Tile-local column index vs (target - lo): no full-tile iota add.
            col = jax.lax.broadcasted_iota(jnp.int32, (TB, TC), 1)
            is_tgt = col == (tgt_ref[...] - lo)
            # Gather x[b, target[b]]: native-dtype select, <=1 nonzero lane per
            # row so the lane reduce is exact; cast only the (TB,1) result.
            c_out[...] += jnp.sum(jnp.where(is_tgt, x_nat, jnp.zeros_like(x_nat)),
                                  axis=-1, keepdims=True).astype(jnp.float32)
            # Exclude the target column from the online-softmax stats; its
            # margin-adjusted term is re-added in the finalize.
            _update(jnp.where(is_tgt, neg_inf, z))

        @pl.when(jnp.logical_not(has_target))
        def _without_target():
            _update(z)

        # TODO(synk): optional flag (inputs guaranteed in [-1,1]) -> static max
        # of s would drop one XLU reduce + the rescale exp per tile.
        # TODO(synk): add pipeline_mode=pl.Buffered(3) on the x BlockSpec if
        # xprof shows exposed DMA at the chosen tile size.

    return kernel


# ----------------------------------------------------------------------------
# Finalize (O(B) scalar work) -- plain JAX, no kernel launch needed.
# ----------------------------------------------------------------------------
def _finalize(row_max_nt, row_sum_nt, cos_raw, *, m, s, easy_margin):
    cos_m = math.cos(m)
    sin_m = math.sin(m)
    mm = math.sin(math.pi - m) * m
    threshold = math.cos(math.pi - m)
    s = float(s)

    # Reference: cos_t = (cos_t - cos_t.min()) / (cos_t.max() / cos_t.min())
    mn = jnp.min(cos_raw)
    mx = jnp.max(cos_raw)
    c = (cos_raw - mn) / (mx / mn)

    if easy_margin:
        cond = c > 0.0                      # relu(cos_t).bool()
        zy_keep = c
    else:
        cond = (c - threshold) > 0.0
        zy_keep = c - mm
    # cos(acos(c)+m) == c*cos(m) - sqrt(1-c^2)*sin(m)  (same NaN domain as ref)
    new_zy = c * cos_m - jnp.sqrt(1.0 - c * c) * sin_m
    new_zy = jnp.where(cond, new_zy, zy_keep)
    diff = new_zy - c

    tgt_new = s * (cos_raw + diff)          # margin-adjusted target logit
    big = jnp.maximum(row_max_nt, tgt_new)
    total = row_sum_nt * jnp.exp(row_max_nt - big) + jnp.exp(tgt_new - big)
    per_row = big + jnp.log(total) - tgt_new
    # TODO(synk): weight= / ignore_index= branches of F.cross_entropy are not
    # implemented (defaults assumed; targets must lie in [0, classes)).
    return jnp.mean(per_row)


# ----------------------------------------------------------------------------
# Wrapper
# ----------------------------------------------------------------------------
def _aligned_divisor(dim, align, cap):
    """Largest multiple of `align` that divides `dim`, capped at `cap`."""
    best = None
    t = align
    while t <= min(dim, cap):
        if dim % t == 0:
            best = t
        t += align
    return best


def arc_loss(x, target, *, classes, m=0.5, s=64.0, easy_margin=True,
             block_b=None, block_c=None):
    B, C = x.shape
    assert C == classes
    itemsize = jnp.dtype(x.dtype).itemsize

    if block_b is None:
        cap_b = 256
        if B >= 16:
            cap_b = min(cap_b, B // 2)   # nb >= 2 so v7x's two TCs both get work
        block_b = _aligned_divisor(B, 8, cap_b) or B
    if block_c is None:
        cap_c = 8192 if itemsize <= 2 else 4096   # ~8 MiB double-buffered x tile
        block_c = C if C <= cap_c else cap_c      # full-extent block or 128-mult.
    assert B % block_b == 0
    assert block_b == B or block_b % 8 == 0
    assert block_c <= C and (block_c == C or block_c % 128 == 0)

    nb = B // block_b
    nc = pl.cdiv(C, block_c)
    ragged = (C % block_c) != 0                   # masked tail in-kernel

    tgt = target.astype(jnp.int32)
    tgt2d = tgt.reshape(B, 1)
    tgt_tiles = tgt.reshape(nb, block_b)
    tmin = jnp.min(tgt_tiles, axis=1)             # scalar-prefetch (SMEM)
    tmax = jnp.max(tgt_tiles, axis=1)

    # Explicit scoped-VMEM limit: double-buffered x tile + small stats, within
    # v7x's 64 MiB physical VMEM (fine on v5e/v6e with 128 MiB).
    x_tile_bytes = block_b * block_c * itemsize
    vmem_limit = int(min(max(2 * x_tile_bytes + (2 << 20), 32 << 20), 48 << 20))

    cost = pl.CostEstimate(
        flops=6 * B * C,
        transcendentals=B * C,
        bytes_accessed=B * C * itemsize + 10 * B * 4,
    )

    stats_shape = jax.ShapeDtypeStruct((B, 1), jnp.float32)
    row_max_nt, row_sum_nt, cos_raw = pl.pallas_call(
        _make_stats_kernel(s, C, ragged),
        out_shape=(stats_shape, stats_shape, stats_shape),
        grid_spec=pltpu.PrefetchScalarGridSpec(
            num_scalar_prefetch=2,
            grid=(nb, nc),
            in_specs=[
                pl.BlockSpec((block_b, block_c), lambda i, j, tmn, tmx: (i, j)),
                pl.BlockSpec((block_b, 1), lambda i, j, tmn, tmx: (i, 0)),
            ],
            out_specs=[
                pl.BlockSpec((block_b, 1), lambda i, j, tmn, tmx: (i, 0)),
                pl.BlockSpec((block_b, 1), lambda i, j, tmn, tmx: (i, 0)),
                pl.BlockSpec((block_b, 1), lambda i, j, tmn, tmx: (i, 0)),
            ],
        ),
        compiler_params=pltpu.CompilerParams(
            dimension_semantics=("parallel", "arbitrary"),
            vmem_limit_bytes=vmem_limit),
        cost_estimate=cost,
    )(tmin, tmax, x, tgt2d)

    return _finalize(row_max_nt, row_sum_nt, cos_raw,
                     m=m, s=s, easy_margin=easy_margin)


if __name__ == "__main__":
    B, C = 16, 500              # C not a multiple of 128 -> exercises ragged tail
    m_, s_, easy_margin = 0.5, 64.0, True

    key = jax.random.PRNGKey(0)
    kx, kt = jax.random.split(key)
    # cosine-similarity-like logits; positive range so the margin branch is live
    x = jax.random.uniform(kx, (B, C), dtype=jnp.float32, minval=0.05, maxval=1.0)
    target = jax.random.randint(kt, (B,), 0, C, dtype=jnp.int32)

    # block_b=8 -> 2 "parallel" batch tiles; block_c=128 -> 4 class tiles with a
    # masked 116-lane tail; also exercises the scalar-prefetch target-skip path.
    loss = arc_loss(x, target, classes=C, m=m_, s=s_, easy_margin=easy_margin,
                    block_b=8, block_c=128)
    jax.block_until_ready(loss)

    # Pure-JAX reference mirroring the PyTorch module.
    def ref_loss(xv, tv):
        xf = xv.astype(jnp.float32)
        cos_t = jnp.take_along_axis(xf, tv[:, None], axis=1)
        cos_t = (cos_t - cos_t.min()) / (cos_t.max() / cos_t.min())
        if easy_margin:
            cond = cos_t > 0
            zy_keep = cos_t
        else:
            cond = (cos_t - math.cos(math.pi - m_)) > 0
            zy_keep = cos_t - math.sin(math.pi - m_) * m_
        new_zy = jnp.cos(jnp.arccos(cos_t) + m_)
        new_zy = jnp.where(cond, new_zy, zy_keep)
        diff = new_zy - cos_t
        onehot = jax.nn.one_hot(tv, C, dtype=xf.dtype)
        logits = (xf + onehot * diff) * s_
        logp = jax.nn.log_softmax(logits, axis=-1)
        return -jnp.mean(jnp.take_along_axis(logp, tv[:, None], axis=1))

    ref = ref_loss(x, target)
    assert jnp.allclose(loss, ref, rtol=5e-3, atol=1e-3), (float(loss), float(ref))
    print("KERNEL_OK")
</pallas_src>

<mosaic_0001>
module attributes {stable_mosaic.version = 11 : i64} {
  func.func @kernel(%arg0: i32, %arg1: i32, %arg2: memref<2xi32, #tpu.memory_space<smem>>, %arg3: memref<2xi32, #tpu.memory_space<smem>>, %arg4: memref<8x128xf32, #tpu.memory_space<vmem>>, %arg5: memref<8x1xi32, #tpu.memory_space<vmem>>, %arg6: memref<8x1xf32, #tpu.memory_space<vmem>>, %arg7: memref<8x1xf32, #tpu.memory_space<vmem>>, %arg8: memref<8x1xf32, #tpu.memory_space<vmem>>) attributes {dimension_semantics = [#tpu.dimension_semantics<parallel>, #tpu.dimension_semantics<arbitrary>], iteration_bounds = array<i64: 2, 4>, scalar_prefetch = 2 : i64, scratch_operands = 0 : i64, tpu.core_type = #tpu.core_type<tc>, window_params = [{transform_indices = @transform_0, window_bounds = array<i64: 8, 128>}, {transform_indices = @transform_1, window_bounds = array<i64: 8, 1>}, {transform_indices = @transform_2, window_bounds = array<i64: 8, 1>}, {transform_indices = @transform_3, window_bounds = array<i64: 8, 1>}, {transform_indices = @transform_4, window_bounds = array<i64: 8, 1>}]} {
    %c128_i32 = arith.constant 128 : i32
    %0 = arith.muli %arg1, %c128_i32 : i32
    %c0_i32 = arith.constant 0 : i32
    %1 = arith.cmpi eq, %arg1, %c0_i32 : i32
    %2 = arith.extui %1 : i1 to i32
    %c0_i32_0 = arith.constant 0 : i32
    %3 = arith.cmpi ne, %2, %c0_i32_0 : i32
    scf.if %3 {
      %cst_6 = arith.constant 0xFF800000 : f32
      %26 = vector.broadcast %cst_6 : f32 to vector<8x1xf32>
      %c0_7 = arith.constant 0 : index
      %c0_8 = arith.constant 0 : index
      %27 = vector.load %arg6[%c0_7, %c0_8] : memref<8x1xf32, #tpu.memory_space<vmem>>, vector<8x1xf32>
      tpu.vector_store %arg6[%c0_7, %c0_8], %26 {strides = array<i32>} : memref<8x1xf32, #tpu.memory_space<vmem>>, vector<8x1xf32>,
      %cst_9 = arith.constant 0.000000e+00 : f32
      %28 = vector.broadcast %cst_9 : f32 to vector<8x1xf32>
      %c0_10 = arith.constant 0 : index
      %c0_11 = arith.constant 0 : index
      %29 = vector.load %arg7[%c0_10, %c0_11] : memref<8x1xf32, #tpu.memory_space<vmem>>, vector<8x1xf32>
      tpu.vector_store %arg7[%c0_10, %c0_11], %28 {strides = array<i32>} : memref<8x1xf32, #tpu.memory_space<vmem>>, vector<8x1xf32>,
      %cst_12 = arith.constant 0.000000e+00 : f32
      %30 = vector.broadcast %cst_12 : f32 to vector<8x1xf32>
      %c0_13 = arith.constant 0 : index
      %c0_14 = arith.constant 0 : index
      %31 = vector.load %arg8[%c0_13, %c0_14] : memref<8x1xf32, #tpu.memory_space<vmem>>, vector<8x1xf32>
      tpu.vector_store %arg8[%c0_13, %c0_14], %30 {strides = array<i32>} : memref<8x1xf32, #tpu.memory_space<vmem>>, vector<8x1xf32>,
    } else {
    }
    %c0 = arith.constant 0 : index
    %c0_1 = arith.constant 0 : index
    %4 = vector.load %arg4[%c0, %c0_1] : memref<8x128xf32, #tpu.memory_space<vmem>>, vector<8x128xf32>
    %cst = arith.constant 6.400000e+01 : f32
    %5 = vector.broadcast %cst : f32 to vector<8x128xf32>
    %6 = arith.mulf %4, %5 : vector<8x128xf32>
    %7 = tpu.iota {dimensions = array<i32: 1>} : vector<8x128xi32>
    %c500_i32 = arith.constant 500 : i32
    %8 = arith.subi %c500_i32, %0 : i32
    %9 = vector.broadcast %8 : i32 to vector<8x128xi32>
    %10 = arith.cmpi slt, %7, %9 : vector<8x128xi32>
    %cst_2 = arith.constant 0xFF800000 : f32
    %11 = vector.broadcast %cst_2 : f32 to vector<8x128xf32>
    %12 = arith.select %10, %6, %11 : vector<8x128xi1>, vector<8x128xf32>
    %13 = arith.index_cast %arg0 : i32 to index
    %14 = memref.load %arg3[%13] : memref<2xi32, #tpu.memory_space<smem>>
    %15 = arith.cmpi sge, %14, %0 : i32
    %16 = arith.index_cast %arg0 : i32 to index
    %17 = memref.load %arg2[%16] : memref<2xi32, #tpu.memory_space<smem>>
    %c128_i32_3 = arith.constant 128 : i32
    %18 = arith.addi %0, %c128_i32_3 : i32
    %19 = arith.cmpi slt, %17, %18 : i32
    %20 = arith.andi %15, %19 : i1
    %21 = arith.extui %20 : i1 to i32
    %c0_i32_4 = arith.constant 0 : i32
    %22 = arith.cmpi ne, %21, %c0_i32_4 : i32
    scf.if %22 {
      %26 = tpu.iota {dimensions = array<i32: 1>} : vector<8x128xi32>
      %c0_6 = arith.constant 0 : index
      %c0_7 = arith.constant 0 : index
      %27 = vector.load %arg5[%c0_6, %c0_7] : memref<8x1xi32, #tpu.memory_space<vmem>>, vector<8x1xi32>
      %28 = vector.broadcast %0 : i32 to vector<8x1xi32>
      %29 = arith.subi %27, %28 : vector<8x1xi32>
      %30 = vector.broadcast %29 : vector<8x1xi32> to vector<8x128xi32>
      %31 = arith.cmpi eq, %26, %30 : vector<8x128xi32>
      %c0_8 = arith.constant 0 : index
      %c0_9 = arith.constant 0 : index
      %32 = vector.load %arg8[%c0_8, %c0_9] : memref<8x1xf32, #tpu.memory_space<vmem>>, vector<8x1xf32>
      %cst_10 = arith.constant 0.000000e+00 : f32
      %33 = vector.broadcast %cst_10 : f32 to vector<8x128xf32>
      %34 = arith.select %31, %4, %33 : vector<8x128xi1>, vector<8x128xf32>
      %cst_11 = arith.constant dense<0.000000e+00> : vector<8xf32>
      %35 = vector.multi_reduction <add>, %34, %cst_11 [1] : vector<8x128xf32> to vector<8xf32>
      %36 = vector.shape_cast %35 : vector<8xf32> to vector<8x1xf32>
      %37 = arith.addf %32, %36 : vector<8x1xf32>
      %c0_12 = arith.constant 0 : index
      %c0_13 = arith.constant 0 : index
      %38 = vector.load %arg8[%c0_12, %c0_13] : memref<8x1xf32, #tpu.memory_space<vmem>>, vector<8x1xf32>
      tpu.vector_store %arg8[%c0_12, %c0_13], %37 {strides = array<i32>} : memref<8x1xf32, #tpu.memory_space<vmem>>, vector<8x1xf32>,
      %cst_14 = arith.constant 0xFF800000 : f32
      %39 = vector.broadcast %cst_14 : f32 to vector<8x128xf32>
      %40 = arith.select %31, %39, %12 : vector<8x128xi1>, vector<8x128xf32>
      %c0_15 = arith.constant 0 : index
      %c0_16 = arith.constant 0 : index
      %41 = vector.load %arg6[%c0_15, %c0_16] : memref<8x1xf32, #tpu.memory_space<vmem>>, vector<8x1xf32>
      %cst_17 = arith.constant dense<0xFF800000> : vector<8xf32>
      %42 = vector.multi_reduction <maximumf>, %40, %cst_17 [1] : vector<8x128xf32> to vector<8xf32>
      %43 = vector.shape_cast %42 : vector<8xf32> to vector<8x1xf32>
      %44 = arith.maximumf %41, %43 : vector<8x1xf32>
      %c0_18 = arith.constant 0 : index
      %c0_19 = arith.constant 0 : index
      %45 = vector.load %arg7[%c0_18, %c0_19] : memref<8x1xf32, #tpu.memory_space<vmem>>, vector<8x1xf32>
      %46 = arith.subf %41, %44 : vector<8x1xf32>
      %47 = math.exp %46 : vector<8x1xf32>
      %48 = arith.mulf %45, %47 : vector<8x1xf32>
      %49 = vector.broadcast %44 : vector<8x1xf32> to vector<8x128xf32>
      %50 = arith.subf %40, %49 : vector<8x128xf32>
      %51 = math.exp %50 : vector<8x128xf32>
      %cst_20 = arith.constant dense<0.000000e+00> : vector<8xf32>
      %52 = vector.multi_reduction <add>, %51, %cst_20 [1] : vector<8x128xf32> to vector<8xf32>
      %53 = vector.shape_cast %52 : vector<8xf32> to vector<8x1xf32>
      %54 = arith.addf %48, %53 : vector<8x1xf32>
      %c0_21 = arith.constant 0 : index
      %c0_22 = arith.constant 0 : index
      %55 = vector.load %arg7[%c0_21, %c0_22] : memref<8x1xf32, #tpu.memory_space<vmem>>, vector<8x1xf32>
      tpu.vector_store %arg7[%c0_21, %c0_22], %54 {strides = array<i32>} : memref<8x1xf32, #tpu.memory_space<vmem>>, vector<8x1xf32>,
      %c0_23 = arith.constant 0 : index
      %c0_24 = arith.constant 0 : index
      %56 = vector.load %arg6[%c0_23, %c0_24] : memref<8x1xf32, #tpu.memory_space<vmem>>, vector<8x1xf32>
      tpu.vector_store %arg6[%c0_23, %c0_24], %44 {strides = array<i32>} : memref<8x1xf32, #tpu.memory_space<vmem>>, vector<8x1xf32>,
    } else {
    }
    %true = arith.constant true
    %23 = arith.xori %20, %true : i1
    %24 = arith.extui %23 : i1 to i32
    %c0_i32_5 = arith.constant 0 : i32
    %25 = arith.cmpi ne, %24, %c0_i32_5 : i32
    scf.if %25 {
      %c0_6 = arith.constant 0 : index
      %c0_7 = arith.constant 0 : index
      %26 = vector.load %arg6[%c0_6, %c0_7] : memref<8x1xf32, #tpu.memory_space<vmem>>, vector<8x1xf32>
      %cst_8 = arith.constant dense<0xFF800000> : vector<8xf32>
      %27 = vector.multi_reduction <maximumf>, %12, %cst_8 [1] : vector<8x128xf32> to vector<8xf32>
      %28 = vector.shape_cast %27 : vector<8xf32> to vector<8x1xf32>
      %29 = arith.maximumf %26, %28 : vector<8x1xf32>
      %c0_9 = arith.constant 0 : index
      %c0_10 = arith.constant 0 : index
      %30 = vector.load %arg7[%c0_9, %c0_10] : memref<8x1xf32, #tpu.memory_space<vmem>>, vector<8x1xf32>
      %31 = arith.subf %26, %29 : vector<8x1xf32>
      %32 = math.exp %31 : vector<8x1xf32>
      %33 = arith.mulf %30, %32 : vector<8x1xf32>
      %34 = vector.broadcast %29 : vector<8x1xf32> to vector<8x128xf32>
      %35 = arith.subf %12, %34 : vector<8x128xf32>
      %36 = math.exp %35 : vector<8x128xf32>
      %cst_11 = arith.constant dense<0.000000e+00> : vector<8xf32>
      %37 = vector.multi_reduction <add>, %36, %cst_11 [1] : vector<8x128xf32> to vector<8xf32>
      %38 = vector.shape_cast %37 : vector<8xf32> to vector<8x1xf32>
      %39 = arith.addf %33, %38 : vector<8x1xf32>
      %c0_12 = arith.constant 0 : index
      %c0_13 = arith.constant 0 : index
      %40 = vector.load %arg7[%c0_12, %c0_13] : memref<8x1xf32, #tpu.memory_space<vmem>>, vector<8x1xf32>
      tpu.vector_store %arg7[%c0_12, %c0_13], %39 {strides = array<i32>} : memref<8x1xf32, #tpu.memory_space<vmem>>, vector<8x1xf32>,
      %c0_14 = arith.constant 0 : index
      %c0_15 = arith.constant 0 : index
      %41 = vector.load %arg6[%c0_14, %c0_15] : memref<8x1xf32, #tpu.memory_space<vmem>>, vector<8x1xf32>
      tpu.vector_store %arg6[%c0_14, %c0_15], %29 {strides = array<i32>} : memref<8x1xf32, #tpu.memory_space<vmem>>, vector<8x1xf32>,
    } else {
    }
    return
  }
  func.func @transform_0(%arg0: i32, %arg1: i32, %arg2: memref<2xi32, #tpu.memory_space<smem>>, %arg3: memref<2xi32, #tpu.memory_space<smem>>) -> (i32, i32) {
    %c0_i32 = arith.constant 0 : i32
    return %arg0, %arg1 : i32, i32
  }
  func.func @transform_1(%arg0: i32, %arg1: i32, %arg2: memref<2xi32, #tpu.memory_space<smem>>, %arg3: memref<2xi32, #tpu.memory_space<smem>>) -> (i32, i32) {
    %c0_i32 = arith.constant 0 : i32
    %c0_i32_0 = arith.constant 0 : i32
    return %arg0, %c0_i32 : i32, i32
  }
  func.func @transform_2(%arg0: i32, %arg1: i32, %arg2: memref<2xi32, #tpu.memory_space<smem>>, %arg3: memref<2xi32, #tpu.memory_space<smem>>) -> (i32, i32) {
    %c0_i32 = arith.constant 0 : i32
    %c0_i32_0 = arith.constant 0 : i32
    return %arg0, %c0_i32 : i32, i32
  }
  func.func @transform_3(%arg0: i32, %arg1: i32, %arg2: memref<2xi32, #tpu.memory_space<smem>>, %arg3: memref<2xi32, #tpu.memory_space<smem>>) -> (i32, i32) {
    %c0_i32 = arith.constant 0 : i32
    %c0_i32_0 = arith.constant 0 : i32
    return %arg0, %c0_i32 : i32, i32
  }
  func.func @transform_4(%arg0: i32, %arg1: i32, %arg2: memref<2xi32, #tpu.memory_space<smem>>, %arg3: memref<2xi32, #tpu.memory_space<smem>>) -> (i32, i32) {
    %c0_i32 = arith.constant 0 : i32
    %c0_i32_0 = arith.constant 0 : i32
    return %arg0, %c0_i32 : i32, i32
  }
}

</mosaic_0001>

<bundles_post_ra>
// kernel: tpu_custom_call.1
= control target key start
LH: loop header
LB: loop body
LE: loop exit
PB: predicated region body
PF: predicated region fallthrough
CT: control target
= control target key end

     0   :  { %s754_s27 = smov [#allocation3]   ;;  %s755_s28 = smov [#allocation4]   ;;  %s971_s0 = inlined_call_operand.vmem [shape: s32[2], index: 0, kind: input, shape index: {}]   ;;  %s972_s2 = inlined_call_operand.hbm [shape: f32[16,500], index: 2, kind: input, shape index: {}]   ;;  %s973_s3 = inlined_call_operand.vmem [shape: s32[16,1], index: 3, kind: input, shape index: {}]   ;;  %s974_s4 = inlined_call_operand.vmem [shape: f32[16,1], index: 4, kind: output, shape index: {0}]   ;;  %s975_s5 = inlined_call_operand.vmem [shape: f32[16,1], index: 5, kind: output, shape index: {1}]   ;;  %s976_s6 = inlined_call_operand.vmem [shape: f32[16,1], index: 6, kind: output, shape index: {2}]   ;;  %s977_s1 = inlined_call_operand.vmem [shape: s32[2], index: 1, kind: input, shape index: {}]  }
   0x1   :  { %s13_s23 = sshll.u32 %s971_s0, 4  ;;  %s18_s26 = sshll.u32 %s977_s1, 4  ;;  %s14_s23 = int_to_ptr.vmem [resolvable:$true] %s13_s23  ;;  %s19_s26 = int_to_ptr.vmem [resolvable:$true] %s18_s26 }
   0x2   :  { %16 = dma.vmem_to_smem %s14_s23, 16, %s754_s27, [#allocation2] }
   0x3   :  { %21 = dma.vmem_to_smem %s19_s26, 16, %s755_s28, [#allocation2] }
   0x4   :  { %716 = dma.done.wait [#allocation2], 32 }
   0x5   :  { %717 = vsyncadd [#allocation2], 4294967264 }
   0x6   :  { %24 = sfence }
   0x7   :  { %25 = vsyncpa [#allocation6], 0 }
   0x8   :  { %27 = vsyncpa [#allocation6 + $0x1], 0  ;;  %s801_s29 = smov 0   ;;  %s803_s30 = smov 0  }
   0x9   :  { %s805_s0 = smov 0   ;;  %s807_s7 = smov 0  }
   0xa   :  { %s809_s1 = smov 0   ;;  %s811_s8 = smov 0  }
   0xb   :  { %s813_s9 = smov 0   ;;  %s815_s10 = smov 0  }
   0xc LB: > { %s525_s11 = sadd.s32 4294967295, %s752_s10   ;;  %s42_s12 = sadd.s32 1, %s744_s8  ;;  %s752_s10 = sphi %s815_s10, %s33_s10   ;;  %s748_s9 = sphi %s813_s9, %s990_s9   ;;  %s744_s8 = sphi %s811_s8, %s989_s8   ;;  %s740_s1 = sphi %s809_s1, %s988_s1   ;;  %s736_s7 = sphi %s807_s7, %s987_s7   ;;  %s732_s0 = sphi %s805_s0, %s986_s0   ;;  %s728_s30 = sphi %s803_s30, %s985_s30   ;;  %s724_s29 = sphi %s801_s29, %s984_s29  }
   0xd   : > { %p43_p0 = scmp.ge.s32.totalorder %s42_s12, 4  ;;  %s45_s13 = sadd.s32 1, %s748_s9 }
   0xe   : > { %s54_s14 = sadd.s32 1, %s732_s0  ;;  %p61_p1 = scmp.ne.s32.totalorder %s732_s0, %s728_s30 }
   0xf   : > { %s992_s12 = smov (%p43_p0, %s42_s12), 0  ;;  %s994_s13 = smov (!%p43_p0, %s45_s13), %s748_s9 }
  0x10   : > { %s50_s15 = ssub.s32 %s744_s8, %s992_s12  ;;  %p62_p2 = scmp.eq.s32.totalorder %s752_s10, 0 }
  0x11   : > { %p47_p3 = scmp.ge.s32.totalorder %s994_s13, 2  ;;  %p67_p4 = scmp.ne.s32.totalorder %s728_s30, %s724_s29 }
  0x12   : > { %p852_p5 = por %p62_p2, %p61_p1  ;;  %p68_p6 = scmp.eq.s32.totalorder %s525_s11, 0 }
  0x13   : > { %s996_s13 = smov (%p47_p3, %s994_s13), 0  ;;  %p548_p8 = scmp.lt.s32.totalorder %s752_s10, 8 }
  0x14   : > { %980 = sst [smem:[#allocation9_spill]] %s996_s13  ;;  %p858_p7 = por %p68_p6, %p67_p4 }
  0x15   : > { %s49_s18 = ssub.s32 %s748_s9, %s996_s13  ;;  %s195_s20 = sand.u32 1, %s732_s0  }
  0x16   : > { %s51_s19 = sor.u32 %s50_s15, %s49_s18  ;;  %s529_s21 = sshll.u32 %s195_s20, 3 }
  0x17   : > { %p52_p9 = scmp.eq.s32.totalorder %s51_s19, 0  ;;  %s530_s22 = sshll.u32 %s748_s9, 2 }
  0x18   : > { %s203_s24 = sadd.s32 %s744_s8, %s530_s22  ;;  %s199_s26 = scalar_lea.vmem [#allocation5], %s529_s21 }
  0x19   : > { %s868_s23 = scalar_select %p52_p9, %s732_s0, %s54_s14  }
  0x1a   : > { %s531_s25 = sshll.u32 %s203_s24, 3  ;;  %s209_s27 = sshll.u32 %s199_s26, 4  ;;  %s210_s27 = int_to_ptr.vmem [resolvable:$true] %s209_s27 }
  0x1b   : > { %s205_s11 = scalar_lea.hbm %s972_s2, %s531_s25  ;;  %p545_p10 = pnand %p548_p8, %p852_p5 }
  0x1c   : > { %s207_s13 = sshll.u32 %s205_s11, 4  ;;  %p532_p11 = scmp.ge.s32.totalorder %s752_s10, 1  ;;  %s208_s13 = int_to_ptr.hbm [resolvable:$true] %s207_s13 }
  0x1d   : > { %p221_p12 = scmp.lt.s32.totalorder %s752_s10, 9  ;;  %s196_s15 = scalar_lea.sflag [#allocation6], %s195_s20 }
  0x1e   : > { %547 = dma.hbm_to_vmem [thread:$0]  (!%p545_p10), %s208_s13, 128, %s210_s27, %s196_s15  }
  0x1f   : > { %p222_p13 = pnand %p532_p11, %p221_p12 }
  0x20   : > { %s227_s14 = sand.u32 (!%p222_p13), 1, %s728_s30  }
  0x21   : > { %225 = sbr.rel (%p222_p13) target bundleno = 913 (0x391), region = 28  ;;  %s533_s18 = sshll.u32 (!%p222_p13), %s227_s14, 3 }
  0x22   : > { %s228_s19 = scalar_lea.sflag (!%p222_p13), [#allocation6], %s227_s14  ;;  %s231_s21 = scalar_lea.vmem (!%p222_p13), [#allocation5], %s533_s18 }
  0x26   : > { %719 = dma.done.wait (%p858_p7), %s228_s19, 128  }
  0x27   : > { %721 = vsyncadd (%p858_p7), %s228_s19, 4294967168  ;;  %p268_p0 = scmp.lt.s32.totalorder %s740_s1, 1  ;;  %s887_s16 = sshll.u32 %s736_s7, 7 }
  0x28   : > { %p539_p1 = scmp.ne.s32.totalorder %s736_s7, 0 }
  0x29   : > { %s269_s13 = scalar_select %p268_p0, %s740_s1, 1 }
  0x2a   : > { %288 = sbr.rel (%p539_p1) target bundleno = 51 (0x33), region = 36 }
  0x2b   : > { %s890_s20 = sshll.u32 %s269_s13, 3 }
  0x2c   : > { %s271_s25 = scalar_lea.vmem %s973_s3, %s890_s20  ;;  %s900_s27 = scalar_lea.vmem %s974_s4, %s890_s20 }
  0x2d   : > { %s906_s11 = scalar_lea.vmem %s975_s5, %s890_s20  ;;  %s912_s18 = scalar_lea.vmem %s976_s6, %s890_s20 }
  0x2f   : > { %vm289_vm0 = vcmask 7168   ;;  %v756_v0 = vmov -inf   ;;  %v757_v1 = vmov 0.0  }
  0x30   : > { %290 = vst.msk [vmem:[%s900_s27] sm:$0xff] %vm289_vm0, %v756_v0 }
  0x31   : > { %291 = vst.msk [vmem:[%s906_s11] sm:$0xff] %vm289_vm0, %v757_v1 }
  0x32   : > { %292 = vst.msk [vmem:[%s912_s18] sm:$0xff] %vm289_vm0, %v757_v1 }
  0x33 PF: > { %v293_v2 = vld [vmem:[%s231_s21] sm:$0xff]  ;;  %v295_v3 = vlaneseq  ;;  %s297_s19 = ssub.s32 500, %s887_s16  ;;  %s301_s7 = sld [smem:[#allocation4 + %s740_s1]] }
  0x34   : > { %v294_v4 = vmul.f32 64.0, %v293_v2  ;;  %v298_v5 = vstv %s297_s19  ;;  %s303_s13 = sld [smem:[#allocation3 + %s740_s1]]  ;;  %s304_s20 = sadd.s32 128, %s887_s16 }
  0x35   : > { %v296_v6 = vand.u32 127, %v295_v3 }
  0x37   : > { %vm299_vm1 = vcmp.lt.s32.totalorder %v296_v6, %v298_v5 }
  0x38   : > { %v300_v7 = vsel %vm299_vm1, %v294_v4, -inf }
  0x39   : > { %p302_p2 = scmp.ge.s32.totalorder %s301_s7, %s887_s16 }
  0x3a   : > { %p305_p3 = scmp.lt.s32.totalorder %s303_s13, %s304_s20 }
  0x3c   : > { %p923_p4 = pnand %p305_p3, %p302_p2 }
  0x3e   : > { %309 = sbr.rel (%p923_p4) target bundleno = 550 (0x226), region = 40 }
  0x43   : > { %v310_v8 = vld [vmem:[%s271_s25] sm:$0xff]  ;;  %v311_v9 = vstv %s887_s16  ;;  %v758_v10 = vmov 0   ;;  %vm322_vm3 = vcmask 7168  }
  0x44   : > { %619 = vset.pattern.permute.xlu0 %v758_v10  ;;  %v312_v11 = vsub.s32 %v310_v8, %v311_v9  ;;  %620 = vset.pattern.permute.xlu1 %v758_v10  ;;  %v325_v14 = vld [vmem:[%s900_s27] sm:$0xff] }
  0x45   : > { %v317_v23 = vld [vmem:[%s912_s18] sm:$0xff] }
  0x46   : > { %314 = vperm.xlu0 %619, %v312_v11   ;;  %v329_v28 = vld [vmem:[%s906_s11] sm:$0xff] }
  0xb8   : > { %v315_v12 = vpop.permute.xlu0 %314 }
  0xb9   : > { %vm316_vm2 = vcmp.eq.s32.totalorder %v296_v6, %v315_v12 }
  0xba   : > { %v324_v13 = vsel %vm316_vm2, -inf, %v300_v7  ;;  %v318_v18 = vsel %vm316_vm2, %v293_v2, 0.0 }
  0xbb   : > { %326 = vmax.xlane.f32.xlu0 %v324_v13 }
 0x12e   : > { %v327_v15 = vpop.xlane.xlu0 %326 }
 0x12f   : > { %v328_v16 = vmax.f32 %v325_v14, %v327_v15 }
 0x131   : > { %v330_v17 = vsub.f32 %v325_v14, %v328_v16  ;;  %346 = vst.msk [vmem:[%s900_s27] sm:$0xff] %vm322_vm3, %v328_v16  ;;  %336 = vperm.xlu1 %620, %v328_v16  }
 0x133   : > { %v331_v26 = vmul.f32 1.442695, %v330_v17 }
 0x15b   : > { %319 = vadd.xlane.f32.xlu1 %v318_v18 }
 0x1a3   : > { %v337_v19 = vpop.permute.xlu1 %336 }
 0x1a4   : > { %v339_v20 = vsub.f32 %v324_v13, %v337_v19 }
 0x1a6   : > { %v340_v21 = vmul.f32 1.442695, %v339_v20 }
 0x1a8   : > { %621 = vpow2.f32 %v340_v21 }
 0x1a9   : > { %623 = vpow2.f32 %v331_v26 }
 0x1ae   : > { %v622_v22 = vpop.eup %621 }
 0x1af   : > { %342 = vadd.xlane.f32.xlu2 %v622_v22  ;;  %v624_v27 = vpop.eup %623 }
 0x1b0   : > { %v333_v29 = vmul.f32 %v624_v27, %v329_v28 }
 0x1ce   : > { %v320_v24 = vpop.xlane.xlu1 %319 }
 0x1cf   : > { %v321_v25 = vadd.f32 %v320_v24, %v317_v23 }
 0x1d1   : > { %323 = vst.msk [vmem:[%s912_s18] sm:$0xff] %vm322_vm3, %v321_v25 }
 0x222   : > { %v343_v30 = vpop.xlane.xlu2 %342 }
 0x223   : > { %v344_v31 = vadd.f32 %v343_v30, %v333_v29 }
 0x225   : > { %345 = vst.msk [vmem:[%s906_s11] sm:$0xff] %vm322_vm3, %v344_v31 }
 0x226 PF: > { %349 = sbr.rel (!%p923_p4) target bundleno = 913 (0x391), region = 44  ;;  %351 = vmax.xlane.f32.xlu0 (%p923_p4), %v300_v7  ;;  %v759_v32 = vmov (%p923_p4), 0   ;;  %v350_v33 = vld [vmem:[%s900_s27] sm:$0xff] (%p923_p4)  ;;  %vm370_vm4 = vcmask (%p923_p4), 7168  }
 0x227   : > { %625 = vset.pattern.permute.xlu0 (%p923_p4), %v759_v32 }
 0x22c   : > { %v354_v43 = vld [vmem:[%s906_s11] sm:$0xff] }
 0x299   : > { %v352_v34 = vpop.xlane.xlu0 %351 }
 0x29a   : > { %v353_v35 = vmax.f32 %v350_v33, %v352_v34 }
 0x29c   : > { %v355_v36 = vsub.f32 %v350_v33, %v353_v35  ;;  %372 = vst.msk [vmem:[%s900_s27] sm:$0xff] %vm370_vm4, %v353_v35  ;;  %361 = vperm.xlu0 %625, %v353_v35  }
 0x29e   : > { %v356_v41 = vmul.f32 1.442695, %v355_v36 }
 0x30e   : > { %v362_v37 = vpop.permute.xlu0 %361 }
 0x30f   : > { %v364_v38 = vsub.f32 %v300_v7, %v362_v37 }
 0x311   : > { %v365_v39 = vmul.f32 1.442695, %v364_v38 }
 0x313   : > { %626 = vpow2.f32 %v365_v39 }
 0x314   : > { %628 = vpow2.f32 %v356_v41 }
 0x319   : > { %v627_v40 = vpop.eup %626 }
 0x31a   : > { %367 = vadd.xlane.f32.xlu1 %v627_v40  ;;  %v629_v42 = vpop.eup %628 }
 0x31b   : > { %v358_v44 = vmul.f32 %v629_v42, %v354_v43 }
 0x38d   : > { %v368_v45 = vpop.xlane.xlu1 %367 }
 0x38e   : > { %v369_v46 = vadd.f32 %v368_v45, %v358_v44 }
 0x390   : > { %371 = vst.msk [vmem:[%s906_s11] sm:$0xff] %vm370_vm4, %v369_v46 }
 0x391 PF: > { %s33_s10 = sadd.s32 1, %s752_s10   ;;  %s983_s21 = sld [smem:[#allocation9_spill]] }
 0x392   : > { %p30_p5 = scmp.ge.s32.totalorder %s33_s10, 10   ;;  %s984_s29 = smov %s728_s30 }
 0x393   : > { %s985_s30 = smov %s732_s0  ;;  %s986_s0 = smov %s868_s23 }
 0x394   : > { %s987_s7 = smov %s744_s8  ;;  %s988_s1 = smov %s748_s9 }
 0x395   : > { %s989_s8 = smov %s992_s12  ;;  %32 = sbr.rel (!%p30_p5) target bundleno = 12 (0xc), region = 107 }
 0x397   : > { %s990_s9 = smov %s983_s21 }
 0x39a   :  { %420 = vsyncpa [#allocation6], 1 }
 0x39b   :  { %422 = vsyncpa [#allocation6 + $0x1], 1 }

</bundles_post_ra>
